<compile_context>
chip_gen: v7x
topology: tpu7x:2x2x1
jax: 0.10.0
libtpu: 0.0.40
codegen_flags: <defaults>
</compile_context>

<pallas_src>
import jax
import jax.numpy as jnp
from jax.experimental import pallas as pl
from jax.experimental.pallas import tpu as pltpu


F_IN, H1, H2, H3 = 338, 256, 128, 64
F_IN_PAD = 384      # 338 -> next multiple of 128 (lane-dense K for fc1)
H3_PAD = 128        # 64  -> 128 (lane-dense fc3 output / fc4 K)
OUT_PAD = 128       # action_space -> 128 (unmasked vst on the output slab)


def dqn_mlp_kernel(x_ref, w1_ref, b1_ref, w2_ref, b2_ref,
                   w3_ref, b3_ref, w4_ref, b4_ref, o_ref):
    # fc1 + ReLU  (bf16 operands on the MXU, f32 accumulate, f32 VPU epilogue)
    h = jnp.dot(x_ref[...], w1_ref[...], preferred_element_type=jnp.float32)
    h = jnp.maximum(h + b1_ref[...], 0.0)
    # fc2 + ReLU
    h = jnp.dot(h.astype(jnp.bfloat16), w2_ref[...],
                preferred_element_type=jnp.float32)
    h = jnp.maximum(h + b2_ref[...], 0.0)
    # fc3 + ReLU (padded cols stay exactly 0: zero weights + zero bias + ReLU)
    h = jnp.dot(h.astype(jnp.bfloat16), w3_ref[...],
                preferred_element_type=jnp.float32)
    h = jnp.maximum(h + b3_ref[...], 0.0)
    # fc4 (no activation); lane-dense 128-wide output slab
    out = jnp.dot(h.astype(jnp.bfloat16), w4_ref[...],
                  preferred_element_type=jnp.float32)
    o_ref[...] = (out + b4_ref[...]).astype(o_ref.dtype)


def _round_up(x, m):
    return (x + m - 1) // m * m


def dqn_dense_forward(obs, params, *, batch_tile=1024):
    """obs: (batch, ...) whose trailing dims flatten to 338 features."""
    batch = obs.shape[0]
    x = obs.reshape(batch, -1).astype(jnp.float32)     # Flatten (glue JAX)
    assert x.shape[1] == F_IN, f"expected {F_IN} features, got {x.shape[1]}"

    (w1, b1), (w2, b2), (w3, b3), (w4, b4) = params
    action_space = w4.shape[1]
    assert action_space <= OUT_PAD

    # ---- layout plumbing: zero-pad to lane/sublane multiples ---------------
    x_p = jnp.pad(x, ((0, 0), (0, F_IN_PAD - F_IN)))
    w1_p = jnp.pad(w1, ((0, F_IN_PAD - F_IN), (0, 0)))
    w3_p = jnp.pad(w3, ((0, 0), (0, H3_PAD - H3)))
    b3_p = jnp.pad(b3, ((0, 0), (0, H3_PAD - H3)))
    w4_p = jnp.pad(w4, ((0, H3_PAD - H3), (0, OUT_PAD - action_space)))
    b4_p = jnp.pad(b4, ((0, 0), (0, OUT_PAD - action_space)))

    # Batch rows -> multiple of 16 (bf16 sublane packing); then tile the grid.
    bp = _round_up(batch, 16)
    if bp > batch_tile:
        bp = _round_up(bp, batch_tile)
        tb = batch_tile
    else:
        tb = bp
    x_p = jnp.pad(x_p, ((0, bp - batch), (0, 0))).astype(jnp.bfloat16)

    # bf16 operands for the MXU; biases stay f32 (f32 bias-add/ReLU, v5e-safe).
    w1_p = w1_p.astype(jnp.bfloat16)
    w2_b = w2.astype(jnp.bfloat16)
    w3_p = w3_p.astype(jnp.bfloat16)
    w4_p = w4_p.astype(jnp.bfloat16)
    b1_f = b1.astype(jnp.float32)
    b2_f = b2.astype(jnp.float32)
    b3_f = b3_p.astype(jnp.float32)
    b4_f = b4_p.astype(jnp.float32)

    grid = (bp // tb,)
    const = lambda i: (0, 0)   # weights/biases: same block every step -> resident

    in_specs = [
        pl.BlockSpec((tb, F_IN_PAD), lambda i: (i, 0)),   # x: tiled over batch
        pl.BlockSpec(w1_p.shape, const),
        pl.BlockSpec(b1_f.shape, const),
        pl.BlockSpec(w2_b.shape, const),
        pl.BlockSpec(b2_f.shape, const),
        pl.BlockSpec(w3_p.shape, const),
        pl.BlockSpec(b3_f.shape, const),
        pl.BlockSpec(w4_p.shape, const),
        pl.BlockSpec(b4_f.shape, const),
    ]
    out_specs = pl.BlockSpec((tb, OUT_PAD), lambda i: (i, 0))

    flops = 2 * bp * (F_IN_PAD * H1 + H1 * H2 + H2 * H3_PAD + H3_PAD * OUT_PAD)
    weight_bytes = sum(int(a.size) * a.dtype.itemsize for a in
                       (w1_p, b1_f, w2_b, b2_f, w3_p, b3_f, w4_p, b4_f))
    io_bytes = int(x_p.size) * 2 + bp * OUT_PAD * 4
    cost = pl.CostEstimate(flops=flops, transcendentals=0,
                           bytes_accessed=weight_bytes + io_bytes)

    out = pl.pallas_call(
        dqn_mlp_kernel,
        out_shape=jax.ShapeDtypeStruct((bp, OUT_PAD), jnp.float32),
        grid=grid,
        in_specs=in_specs,
        out_specs=out_specs,
        compiler_params=pltpu.CompilerParams(
            dimension_semantics=("parallel",)),
        cost_estimate=cost,
    )(x_p, w1_p, b1_f, w2_b, b2_f, w3_p, b3_f, w4_p, b4_f)

    # Slice the lane-dense slab back to the logical (batch, action_space).
    return out[:batch, :action_space]


def init_params(key, action_space):
    """Deterministic init matching nn.Linear shapes, stored as (in, out)."""
    dims = [(F_IN, H1), (H1, H2), (H2, H3), (H3, action_space)]
    params = []
    for (d_in, d_out) in dims:
        key, kw, kb = jax.random.split(key, 3)
        bound = 1.0 / jnp.sqrt(d_in)
        w = jax.random.uniform(kw, (d_in, d_out), jnp.float32, -bound, bound)
        b = jax.random.uniform(kb, (1, d_out), jnp.float32, -bound, bound)
        params.append((w, b))
    return params


def reference_forward(obs, params):
    """Pure-JAX reference mirroring the kernel's bf16-operand / f32-acc math."""
    batch = obs.shape[0]
    h = obs.reshape(batch, -1).astype(jnp.float32).astype(jnp.bfloat16)
    for i, (w, b) in enumerate(params):
        h = jnp.dot(h, w.astype(jnp.bfloat16),
                    preferred_element_type=jnp.float32) + b
        if i < 3:
            h = jnp.maximum(h, 0.0).astype(jnp.bfloat16)
    return h


if __name__ == "__main__":
    key = jax.random.PRNGKey(0)
    key, k_obs = jax.random.split(key)

    action_space = 4
    batch = 2
    # 338 = 2 * 13 * 13 : obs shape that the Flatten layer reduces to 338.
    obs = jax.random.normal(k_obs, (batch, 2, 13, 13), jnp.float32)

    params = init_params(key, action_space)

    out = dqn_dense_forward(obs, params)
    out = jax.block_until_ready(out)

    ref = reference_forward(obs, params)
    assert out.shape == (batch, action_space)
    assert jnp.allclose(out, ref, atol=2e-2, rtol=2e-2), (
        f"max abs err {jnp.max(jnp.abs(out - ref))}")

    print("KERNEL_OK")
</pallas_src>

<mosaic_0001>
module attributes {stable_mosaic.version = 11 : i64} {
  func.func @dqn_mlp_kernel(%arg0: i32, %arg1: memref<16x384xbf16, #tpu.memory_space<vmem>>, %arg2: memref<384x256xbf16, #tpu.memory_space<vmem>>, %arg3: memref<1x256xf32, #tpu.memory_space<vmem>>, %arg4: memref<256x128xbf16, #tpu.memory_space<vmem>>, %arg5: memref<1x128xf32, #tpu.memory_space<vmem>>, %arg6: memref<128x128xbf16, #tpu.memory_space<vmem>>, %arg7: memref<1x128xf32, #tpu.memory_space<vmem>>, %arg8: memref<128x128xbf16, #tpu.memory_space<vmem>>, %arg9: memref<1x128xf32, #tpu.memory_space<vmem>>, %arg10: memref<16x128xf32, #tpu.memory_space<vmem>>) attributes {dimension_semantics = [#tpu.dimension_semantics<parallel>], iteration_bounds = array<i64: 1>, scalar_prefetch = 0 : i64, scratch_operands = 0 : i64, tpu.core_type = #tpu.core_type<tc>, window_params = [{transform_indices = @transform_0, window_bounds = array<i64: 16, 384>}, {pipeline_mode = #tpu.pipeline_mode<synchronous>, transform_indices = @transform_1, window_bounds = array<i64: 384, 256>}, {pipeline_mode = #tpu.pipeline_mode<synchronous>, transform_indices = @transform_2, window_bounds = array<i64: 1, 256>}, {pipeline_mode = #tpu.pipeline_mode<synchronous>, transform_indices = @transform_3, window_bounds = array<i64: 256, 128>}, {pipeline_mode = #tpu.pipeline_mode<synchronous>, transform_indices = @transform_4, window_bounds = array<i64: 1, 128>}, {pipeline_mode = #tpu.pipeline_mode<synchronous>, transform_indices = @transform_5, window_bounds = array<i64: 128, 128>}, {pipeline_mode = #tpu.pipeline_mode<synchronous>, transform_indices = @transform_6, window_bounds = array<i64: 1, 128>}, {pipeline_mode = #tpu.pipeline_mode<synchronous>, transform_indices = @transform_7, window_bounds = array<i64: 128, 128>}, {pipeline_mode = #tpu.pipeline_mode<synchronous>, transform_indices = @transform_8, window_bounds = array<i64: 1, 128>}, {transform_indices = @transform_9, window_bounds = array<i64: 16, 128>}]} {
    %c0 = arith.constant 0 : index
    %c0_0 = arith.constant 0 : index
    %0 = vector.load %arg1[%c0, %c0_0] : memref<16x384xbf16, #tpu.memory_space<vmem>>, vector<16x384xbf16>
    %c0_1 = arith.constant 0 : index
    %c0_2 = arith.constant 0 : index
    %1 = vector.load %arg2[%c0_1, %c0_2] : memref<384x256xbf16, #tpu.memory_space<vmem>>, vector<384x256xbf16>
    %cst = arith.constant dense<0.000000e+00> : vector<16x256xf32>
    %2 = tpu.matmul %0, %1, %cst {dimension_numbers = #tpu.dot_dimension_numbers<[1], [0], [0], [1], [0, 0, 1, 1], [], []>} : vector<16x384xbf16>, vector<384x256xbf16>, vector<16x256xf32> -> vector<16x256xf32>
    %c0_3 = arith.constant 0 : index
    %c0_4 = arith.constant 0 : index
    %3 = vector.load %arg3[%c0_3, %c0_4] : memref<1x256xf32, #tpu.memory_space<vmem>>, vector<1x256xf32>
    %4 = vector.broadcast %3 : vector<1x256xf32> to vector<16x256xf32>
    %5 = arith.addf %2, %4 : vector<16x256xf32>
    %cst_5 = arith.constant 0.000000e+00 : f32
    %6 = vector.broadcast %cst_5 : f32 to vector<16x256xf32>
    %7 = arith.maximumf %5, %6 : vector<16x256xf32>
    %8 = arith.truncf %7 : vector<16x256xf32> to vector<16x256xbf16>
    %c0_6 = arith.constant 0 : index
    %c0_7 = arith.constant 0 : index
    %9 = vector.load %arg4[%c0_6, %c0_7] : memref<256x128xbf16, #tpu.memory_space<vmem>>, vector<256x128xbf16>
    %cst_8 = arith.constant dense<0.000000e+00> : vector<16x128xf32>
    %10 = tpu.matmul %8, %9, %cst_8 {dimension_numbers = #tpu.dot_dimension_numbers<[1], [0], [0], [1], [0, 0, 1, 1], [], []>} : vector<16x256xbf16>, vector<256x128xbf16>, vector<16x128xf32> -> vector<16x128xf32>
    %c0_9 = arith.constant 0 : index
    %c0_10 = arith.constant 0 : index
    %11 = vector.load %arg5[%c0_9, %c0_10] : memref<1x128xf32, #tpu.memory_space<vmem>>, vector<1x128xf32>
    %12 = vector.broadcast %11 : vector<1x128xf32> to vector<16x128xf32>
    %13 = arith.addf %10, %12 : vector<16x128xf32>
    %cst_11 = arith.constant 0.000000e+00 : f32
    %14 = vector.broadcast %cst_11 : f32 to vector<16x128xf32>
    %15 = arith.maximumf %13, %14 : vector<16x128xf32>
    %16 = arith.truncf %15 : vector<16x128xf32> to vector<16x128xbf16>
    %c0_12 = arith.constant 0 : index
    %c0_13 = arith.constant 0 : index
    %17 = vector.load %arg6[%c0_12, %c0_13] : memref<128x128xbf16, #tpu.memory_space<vmem>>, vector<128x128xbf16>
    %cst_14 = arith.constant dense<0.000000e+00> : vector<16x128xf32>
    %18 = tpu.matmul %16, %17, %cst_14 {dimension_numbers = #tpu.dot_dimension_numbers<[1], [0], [0], [1], [0, 0, 1, 1], [], []>} : vector<16x128xbf16>, vector<128x128xbf16>, vector<16x128xf32> -> vector<16x128xf32>
    %c0_15 = arith.constant 0 : index
    %c0_16 = arith.constant 0 : index
    %19 = vector.load %arg7[%c0_15, %c0_16] : memref<1x128xf32, #tpu.memory_space<vmem>>, vector<1x128xf32>
    %20 = vector.broadcast %19 : vector<1x128xf32> to vector<16x128xf32>
    %21 = arith.addf %18, %20 : vector<16x128xf32>
    %cst_17 = arith.constant 0.000000e+00 : f32
    %22 = vector.broadcast %cst_17 : f32 to vector<16x128xf32>
    %23 = arith.maximumf %21, %22 : vector<16x128xf32>
    %24 = arith.truncf %23 : vector<16x128xf32> to vector<16x128xbf16>
    %c0_18 = arith.constant 0 : index
    %c0_19 = arith.constant 0 : index
    %25 = vector.load %arg8[%c0_18, %c0_19] : memref<128x128xbf16, #tpu.memory_space<vmem>>, vector<128x128xbf16>
    %cst_20 = arith.constant dense<0.000000e+00> : vector<16x128xf32>
    %26 = tpu.matmul %24, %25, %cst_20 {dimension_numbers = #tpu.dot_dimension_numbers<[1], [0], [0], [1], [0, 0, 1, 1], [], []>} : vector<16x128xbf16>, vector<128x128xbf16>, vector<16x128xf32> -> vector<16x128xf32>
    %c0_21 = arith.constant 0 : index
    %c0_22 = arith.constant 0 : index
    %27 = vector.load %arg9[%c0_21, %c0_22] : memref<1x128xf32, #tpu.memory_space<vmem>>, vector<1x128xf32>
    %28 = vector.broadcast %27 : vector<1x128xf32> to vector<16x128xf32>
    %29 = arith.addf %26, %28 : vector<16x128xf32>
    %c0_23 = arith.constant 0 : index
    %c0_24 = arith.constant 0 : index
    %30 = vector.load %arg10[%c0_23, %c0_24] : memref<16x128xf32, #tpu.memory_space<vmem>>, vector<16x128xf32>
    tpu.vector_store %arg10[%c0_23, %c0_24], %29 {strides = array<i32>} : memref<16x128xf32, #tpu.memory_space<vmem>>, vector<16x128xf32>,
    return
  }
  func.func @transform_0(%arg0: i32) -> (i32, i32) {
    %c0_i32 = arith.constant 0 : i32
    %c0_i32_0 = arith.constant 0 : i32
    return %arg0, %c0_i32 : i32, i32
  }
  func.func @transform_1(%arg0: i32) -> (i32, i32) {
    %c0_i32 = arith.constant 0 : i32
    %c0_i32_0 = arith.constant 0 : i32
    %c0_i32_1 = arith.constant 0 : i32
    return %c0_i32, %c0_i32_0 : i32, i32
  }
  func.func @transform_2(%arg0: i32) -> (i32, i32) {
    %c0_i32 = arith.constant 0 : i32
    %c0_i32_0 = arith.constant 0 : i32
    %c0_i32_1 = arith.constant 0 : i32
    return %c0_i32, %c0_i32_0 : i32, i32
  }
  func.func @transform_3(%arg0: i32) -> (i32, i32) {
    %c0_i32 = arith.constant 0 : i32
    %c0_i32_0 = arith.constant 0 : i32
    %c0_i32_1 = arith.constant 0 : i32
    return %c0_i32, %c0_i32_0 : i32, i32
  }
  func.func @transform_4(%arg0: i32) -> (i32, i32) {
    %c0_i32 = arith.constant 0 : i32
    %c0_i32_0 = arith.constant 0 : i32
    %c0_i32_1 = arith.constant 0 : i32
    return %c0_i32, %c0_i32_0 : i32, i32
  }
  func.func @transform_5(%arg0: i32) -> (i32, i32) {
    %c0_i32 = arith.constant 0 : i32
    %c0_i32_0 = arith.constant 0 : i32
    %c0_i32_1 = arith.constant 0 : i32
    return %c0_i32, %c0_i32_0 : i32, i32
  }
  func.func @transform_6(%arg0: i32) -> (i32, i32) {
    %c0_i32 = arith.constant 0 : i32
    %c0_i32_0 = arith.constant 0 : i32
    %c0_i32_1 = arith.constant 0 : i32
    return %c0_i32, %c0_i32_0 : i32, i32
  }
  func.func @transform_7(%arg0: i32) -> (i32, i32) {
    %c0_i32 = arith.constant 0 : i32
    %c0_i32_0 = arith.constant 0 : i32
    %c0_i32_1 = arith.constant 0 : i32
    return %c0_i32, %c0_i32_0 : i32, i32
  }
  func.func @transform_8(%arg0: i32) -> (i32, i32) {
    %c0_i32 = arith.constant 0 : i32
    %c0_i32_0 = arith.constant 0 : i32
    %c0_i32_1 = arith.constant 0 : i32
    return %c0_i32, %c0_i32_0 : i32, i32
  }
  func.func @transform_9(%arg0: i32) -> (i32, i32) {
    %c0_i32 = arith.constant 0 : i32
    %c0_i32_0 = arith.constant 0 : i32
    return %arg0, %c0_i32 : i32, i32
  }
}

</mosaic_0001>

<bundles_post_ra>
// kernel: tpu_custom_call.1
= control target key start
LH: loop header
LB: loop body
LE: loop exit
PB: predicated region body
PF: predicated region fallthrough
CT: control target
= control target key end

     0   :  { %14 = vsyncpa [#allocation3], 0  ;;  %s1562_s0 = inlined_call_operand.hbm [shape: bf16[16,384], index: 0, kind: input, shape index: {}]   ;;  %s1563_s1 = inlined_call_operand.hbm [shape: bf16[384,256], index: 1, kind: input, shape index: {}]   ;;  %s1564_s2 = inlined_call_operand.vmem [shape: f32[1,256], index: 2, kind: input, shape index: {}]   ;;  %s1565_s3 = inlined_call_operand.hbm [shape: bf16[256,128], index: 3, kind: input, shape index: {}]   ;;  %s1566_s4 = inlined_call_operand.vmem [shape: f32[1,128], index: 4, kind: input, shape index: {}]   ;;  %s1567_s5 = inlined_call_operand.hbm [shape: bf16[128,128], index: 5, kind: input, shape index: {}]   ;;  %s1568_s6 = inlined_call_operand.vmem [shape: f32[1,128], index: 6, kind: input, shape index: {}]   ;;  %s1569_s7 = inlined_call_operand.hbm [shape: bf16[128,128], index: 7, kind: input, shape index: {}]   ;;  %s1570_s8 = inlined_call_operand.vmem [shape: f32[1,128], index: 8, kind: input, shape index: {}]   ;;  %s1571_s9 = inlined_call_operand.hbm [shape: f32[16,128], index: 9, kind: output, shape index: {}]  }
   0x1   :  { %15 = vsyncpa [#allocation6], 0 }
   0x2   :  { %16 = vsyncpa [#allocation9], 0 }
   0x3   :  { %17 = vsyncpa [#allocation4], 0  ;;  %s1378_s30 = smov [#allocation5]   ;;  %s1238_s13 = scalar_lea.hbm %s1563_s1, 6144 }
   0x4   :  { %s35_s10 = sshll.u32 %s1378_s30, 4  ;;  %p1239_p0 = scmp.ne.s32.totalorder %s1563_s1, %s1238_s13  ;;  %s36_s10 = int_to_ptr.vmem [resolvable:$true] %s35_s10 }
   0x5   :  { %p1242_p1 = scmp.lt.u32.totalorder %s1238_s13, %s1563_s1 }
   0x7   :  { %p1244_p2 = pnand %p1242_p1, %p1239_p0 }
   0x9   :  { %1247 = shalt.err (!%p1244_p2)
}
   0xa   :  { %s1248_s18 = scalar_lea.vmem %s36_s10, 6144  ;;  %p1253_p4 = scmp.lt.s32.totalorder %s36_s10, %s36_s10 }
   0xb   :  { %p1249_p3 = scmp.ne.s32.totalorder %s36_s10, %s1248_s18  ;;  %p1254_p5 = scmp.lt.s32.totalorder %s1248_s18, %s1248_s18 }
   0xd   :  { %p1255_p6 = por %p1254_p5, %p1253_p4 }
   0xf   :  { %p1256_p7 = pnand %p1255_p6, %p1249_p3 }
  0x11   :  { %1259 = shalt.err (!%p1256_p7)
}
  0x12   :  { %s1379_s19 = smov 128   ;;  %s1380_s20 = smov 8  }
  0x13   :  { %41 = dma.hbm_to_vmem [thread:$0]  %s1563_s1, 6144, %s36_s10, [#allocation6], %s1379_s19, %s1379_s19, %s1380_s20  }
  0x14   :  { %s1381_s23 = smov [#allocation8]   ;;  %s1382_s25 = smov [#allocation2]  }
  0x15   :  { %s63_s24 = sshll.u32 %s1381_s23, 4  ;;  %s23_s26 = sshll.u32 %s1382_s25, 4  ;;  %s64_s24 = int_to_ptr.vmem [resolvable:$true] %s63_s24  ;;  %s24_s26 = int_to_ptr.vmem [resolvable:$true] %s23_s26 }
  0x16   :  { %s1260_s29 = scalar_lea.hbm %s1567_s5, 1024 }
  0x17   :  { %p1261_p8 = scmp.ne.s32.totalorder %s1567_s5, %s1260_s29  ;;  %p1264_p9 = scmp.lt.u32.totalorder %s1260_s29, %s1567_s5 }
  0x19   :  { %p1266_p10 = pnand %p1264_p9, %p1261_p8 }
  0x1b   :  { %1269 = shalt.err (!%p1266_p10)
}
  0x1c   :  { %s1270_s1 = scalar_lea.vmem %s64_s24, 1024  ;;  %p1275_p12 = scmp.lt.s32.totalorder %s64_s24, %s64_s24 }
  0x1d   :  { %p1271_p11 = scmp.ne.s32.totalorder %s64_s24, %s1270_s1  ;;  %p1276_p13 = scmp.lt.s32.totalorder %s1270_s1, %s1270_s1 }
  0x1f   :  { %p1277_p0 = por %p1276_p13, %p1275_p12 }
  0x21   :  { %p1278_p1 = pnand %p1277_p0, %p1271_p11 }
  0x23   :  { %1281 = shalt.err (!%p1278_p1)
}
  0x24   :  { %s1383_s10 = smov 64   ;;  %s1384_s14 = smov 4  }
  0x25   :  { %69 = dma.hbm_to_vmem [thread:$0]  %s1567_s5, 1024, %s64_s24, [#allocation9], %s1383_s10, %s1383_s10, %s1384_s14  }
  0x26   :  { %s1282_s21 = scalar_lea.hbm %s1562_s0, 384 }
  0x27   :  { %p1283_p2 = scmp.ne.s32.totalorder %s1562_s0, %s1282_s21  ;;  %p1286_p3 = scmp.lt.u32.totalorder %s1282_s21, %s1562_s0 }
  0x29   :  { %p1288_p4 = pnand %p1286_p3, %p1283_p2 }
  0x2b   :  { %1291 = shalt.err (!%p1288_p4)
}
  0x2c   :  { %s1292_s28 = scalar_lea.vmem %s24_s26, 384  ;;  %p1297_p6 = scmp.lt.s32.totalorder %s24_s26, %s24_s26 }
  0x2d   :  { %p1293_p5 = scmp.ne.s32.totalorder %s24_s26, %s1292_s28  ;;  %p1298_p7 = scmp.lt.s32.totalorder %s1292_s28, %s1292_s28 }
  0x2f   :  { %p1299_p8 = por %p1298_p7, %p1297_p6 }
  0x31   :  { %p1300_p9 = pnand %p1299_p8, %p1293_p5 }
  0x33   :  { %1303 = shalt.err (!%p1300_p9)
}
  0x34   :  { %s1385_s5 = smov 192   ;;  %s1386_s24 = smov 12  }
  0x35   :  { %29 = dma.hbm_to_vmem [thread:$0]  %s1562_s0, 384, %s24_s26, [#allocation3], %s1385_s5, %s1385_s5, %s1386_s24  }
  0x36   :  { %s1387_s11 = smov [#allocation7]   ;;  %s1388_s13 = smov [#allocation10]  }
  0x37   :  { %s49_s12 = sshll.u32 %s1387_s11, 4  ;;  %s77_s1 = sshll.u32 %s1388_s13, 4  ;;  %s50_s12 = int_to_ptr.vmem [resolvable:$true] %s49_s12  ;;  %s78_s1 = int_to_ptr.vmem [resolvable:$true] %s77_s1 }
  0x38   :  { %s1304_s17 = scalar_lea.hbm %s1565_s3, 2048 }
  0x39   :  { %p1305_p10 = scmp.ne.s32.totalorder %s1565_s3, %s1304_s17  ;;  %p1308_p11 = scmp.lt.u32.totalorder %s1304_s17, %s1565_s3 }
  0x3b   :  { %p1310_p12 = pnand %p1308_p11, %p1305_p10 }
  0x3d   :  { %1313 = shalt.err (!%p1310_p12)
}
  0x3e   :  { %s1314_s0 = scalar_lea.vmem %s50_s12, 2048  ;;  %p1319_p0 = scmp.lt.s32.totalorder %s50_s12, %s50_s12 }
  0x3f   :  { %p1315_p13 = scmp.ne.s32.totalorder %s50_s12, %s1314_s0  ;;  %p1320_p1 = scmp.lt.s32.totalorder %s1314_s0, %s1314_s0 }
  0x41   :  { %p1321_p2 = por %p1320_p1, %p1319_p0 }
  0x43   :  { %p1322_p3 = pnand %p1321_p2, %p1315_p13 }
  0x45   :  { %1325 = shalt.err (!%p1322_p3)
}
  0x46   :  { %55 = dma.hbm_to_vmem [thread:$0]  %s1565_s3, 2048, %s50_s12, [#allocation6], %s1383_s10, %s1383_s10, %s1384_s14  }
  0x47   :  { %s1326_s5 = scalar_lea.hbm %s1569_s7, 1024 }
  0x48   :  { %p1327_p4 = scmp.ne.s32.totalorder %s1569_s7, %s1326_s5  ;;  %p1330_p5 = scmp.lt.u32.totalorder %s1326_s5, %s1569_s7 }
  0x4a   :  { %p1332_p6 = pnand %p1330_p5, %p1327_p4 }
  0x4c   :  { %1335 = shalt.err (!%p1332_p6)
}
  0x4d   :  { %s1336_s13 = scalar_lea.vmem %s78_s1, 1024  ;;  %p1341_p8 = scmp.lt.s32.totalorder %s78_s1, %s78_s1 }
  0x4e   :  { %p1337_p7 = scmp.ne.s32.totalorder %s78_s1, %s1336_s13  ;;  %p1342_p9 = scmp.lt.s32.totalorder %s1336_s13, %s1336_s13 }
  0x50   :  { %p1343_p10 = por %p1342_p9, %p1341_p8 }
  0x52   :  { %p1344_p11 = pnand %p1343_p10, %p1337_p7 }
  0x54   :  { %1347 = shalt.err (!%p1344_p11)
}
  0x55   :  { %83 = dma.hbm_to_vmem [thread:$0]  %s1569_s7, 1024, %s78_s1, [#allocation9], %s1383_s10, %s1383_s10, %s1384_s14  }
  0x56   :  { %1370 = dma.done.wait [#allocation3], 384  }
  0x57   :  { %1371 = vsyncadd [#allocation3], 4294966912 }
  0x58   :  { %1372 = dma.done.wait [#allocation6], 8192  }
  0x59   :  { %1373 = vsyncadd [#allocation6], 4294959104 }
  0x5a   :  { %1374 = dma.done.wait [#allocation9], 2048  }
  0x5b   :  { %1375 = vsyncadd [#allocation9], 4294965248  ;;  %v1130_v0 = vld [vmem:[#allocation5 + $0x4] ss:$8 sps:$4 sm:$0xff]   ;;  %v1132_v1 = vld [vmem:[#allocation5] ss:$8 sps:$4 sm:$0xff]  }
  0x5c   :  { %422 = vmatprep.subr.bf16.mxu0 %v1130_v0  ;;  %v1133_v2 = vld [vmem:[#allocation5 + $0x14] ss:$8 sps:$4 sm:$0xff]   ;;  %v1135_v3 = vld [vmem:[#allocation5 + $0x10] ss:$8 sps:$4 sm:$0xff]   ;;  %v1136_v4 = vld [vmem:[#allocation5 + $0x24] ss:$8 sps:$4 sm:$0xff]  }
  0x5d   :  { %423 = vmatpush1.bf16.msra.mxu0 %v1132_v1  ;;  %v1138_v5 = vld [vmem:[#allocation5 + $0x20] ss:$8 sps:$4 sm:$0xff]   ;;  %v1139_v6 = vld [vmem:[#allocation5 + $0x34] ss:$8 sps:$4 sm:$0xff]   ;;  %v1141_v7 = vld [vmem:[#allocation5 + $0x30] ss:$8 sps:$4 sm:$0xff]  }
  0x5e   :  { %424 = vmatprep.subr.bf16.mxu0 %v1133_v2  ;;  %v1142_v8 = vld [vmem:[#allocation5 + $0x44] ss:$8 sps:$4 sm:$0xff]   ;;  %v1144_v9 = vld [vmem:[#allocation5 + $0x40] ss:$8 sps:$4 sm:$0xff]   ;;  %v1145_v10 = vld [vmem:[#allocation5 + $0x54] ss:$8 sps:$4 sm:$0xff]  }
  0x5f   :  { %v1147_v11 = vld [vmem:[#allocation5 + $0x50] ss:$8 sps:$4 sm:$0xff]   ;;  %v1148_v12 = vld [vmem:[#allocation5 + $0x64] ss:$8 sps:$4 sm:$0xff]   ;;  %v1150_v14 = vld [vmem:[#allocation5 + $0x60] ss:$8 sps:$4 sm:$0xff]  }
  0x60   :  { %v1180_v13 = vld [vmem:[#allocation2 + $0x4] ss:$12 sps:$4 sm:$0xff]   ;;  %v1151_v15 = vld [vmem:[#allocation5 + $0x74] ss:$8 sps:$4 sm:$0xff]   ;;  %v1156_v18 = vld [vmem:[#allocation5 + $0x80] ss:$8 sps:$4 sm:$0xff]  }
  0x61   :  { %425 = vmatpush1.bf16.msra.mxu0 %v1135_v3  ;;  %454 = vmatprep.mubr.bf16.mxu0 %v1180_v13  ;;  %v1153_v16 = vld [vmem:[#allocation5 + $0x70] ss:$8 sps:$4 sm:$0xff]   ;;  %v1154_v17 = vld [vmem:[#allocation5 + $0x84] ss:$8 sps:$4 sm:$0xff]   ;;  %v1157_v19 = vld [vmem:[#allocation5 + $0x94] ss:$8 sps:$4 sm:$0xff]  }
  0x62   :  { %426 = vmatprep.subr.bf16.mxu0 %v1136_v4  ;;  %v1159_v20 = vld [vmem:[#allocation5 + $0x90] ss:$8 sps:$4 sm:$0xff]   ;;  %v1160_v21 = vld [vmem:[#allocation5 + $0xa4] ss:$8 sps:$4 sm:$0xff]   ;;  %v1162_v24 = vld [vmem:[#allocation5 + $0xa0] ss:$8 sps:$4 sm:$0xff]  }
  0x63   :  { %v1206_v22 = vld [vmem:[#allocation7 + $0x40] sm:$0xff]   ;;  %v1208_v25 = vld [vmem:[#allocation7 + $0x48] sm:$0xff]   ;;  %v1210_v27 = vld [vmem:[#allocation7 + $0x50] sm:$0xff]   ;;  %v1389_v49 = vmov 0   ;;  %v1390_v4 = vmov 0.0   ;;  %vm1391_vm0 = vmmov 0  }
  0x64   :  { %v1207_v23 = vld [vmem:[#allocation7] sm:$0xff]   ;;  %1027 = vmatprep.subr.bf16.mxu1 %v1206_v22  ;;  %v1209_v26 = vld [vmem:[#allocation7 + $0x8] sm:$0xff]   ;;  %v1163_v28 = vld [vmem:[#allocation5 + $0xb4] ss:$8 sps:$4 sm:$0xff]   ;;  %s1392_s17 = smov [#allocation11]  }
  0x65   :  { %427 = vmatpush1.bf16.msra.mxu0 %v1138_v5  ;;  %1028 = vmatpush3.bf16.msra.mxu1 %v1207_v23  ;;  %v1165_v29 = vld [vmem:[#allocation5 + $0xb0] ss:$8 sps:$4 sm:$0xff]   ;;  %v1166_v32 = vld [vmem:[#allocation5 + $0xc4] ss:$8 sps:$4 sm:$0xff]   ;;  %v1168_v33 = vld [vmem:[#allocation5 + $0xc0] ss:$8 sps:$4 sm:$0xff]   ;;  %v156_v5 = vlaneseq }
  0x66   :  { %428 = vmatprep.subr.bf16.mxu0 %v1139_v6  ;;  %1029 = vmatprep.subr.bf16.mxu1 %v1208_v25  ;;  %v1211_v30 = vld [vmem:[#allocation7 + $0x10] sm:$0xff]   ;;  %v1212_v31 = vld [vmem:[#allocation7 + $0x58] sm:$0xff]   ;;  %v1214_v35 = vld [vmem:[#allocation7 + $0x60] sm:$0xff]   ;;  %s927_s18 = sshll.u32 %s1392_s17, 4  ;;  %s928_s18 = int_to_ptr.vmem [resolvable:$true] %s927_s18 }
  0x67   :  { %v1213_v34 = vld [vmem:[#allocation7 + $0x18] sm:$0xff]   ;;  %v1215_v37 = vld [vmem:[#allocation7 + $0x20] sm:$0xff]   ;;  %v1216_v39 = vld [vmem:[#allocation7 + $0x68] sm:$0xff]   ;;  %v157_v6 = vshrl.u32 %v156_v5, 7  ;;  %p1353_p13 = scmp.lt.s32.totalorder %s928_s18, %s928_s18 }
  0x68   :  { %v1169_v36 = vld [vmem:[#allocation5 + $0xd4] ss:$8 sps:$4 sm:$0xff]   ;;  %v1171_v38 = vld [vmem:[#allocation5 + $0xd0] ss:$8 sps:$4 sm:$0xff]   ;;  %v1172_v40 = vld [vmem:[#allocation5 + $0xe4] ss:$8 sps:$4 sm:$0xff]  }
  0x69   :  { %429 = vmatpush1.bf16.msra.mxu0 %v1141_v7  ;;  %1030 = vmatpush3.bf16.msra.mxu1 %v1209_v26  ;;  %v1174_v41 = vld [vmem:[#allocation5 + $0xe0] ss:$8 sps:$4 sm:$0xff]   ;;  %v1175_v42 = vld [vmem:[#allocation5 + $0xf4] ss:$8 sps:$4 sm:$0xff]   ;;  %v1177_v43 = vld [vmem:[#allocation5 + $0xf0] ss:$8 sps:$4 sm:$0xff]  }
  0x6a   :  { %430 = vmatprep.subr.bf16.mxu0 %v1142_v8  ;;  %1031 = vmatprep.subr.bf16.mxu1 %v1210_v27  ;;  %v1183_v44 = vld [vmem:[#allocation5 + $0x104] ss:$8 sps:$4 sm:$0xff]   ;;  %v1178_v45 = vld [vmem:[#allocation2] ss:$12 sps:$4 sm:$0xff]   ;;  %v1184_v48 = vld [vmem:[#allocation5 + $0x110] ss:$8 sps:$4 sm:$0xff]  }
  0x6b   :  { %v1181_v46 = vld [vmem:[#allocation5 + $0x100] ss:$8 sps:$4 sm:$0xff]   ;;  %v1186_v47 = vld [vmem:[#allocation5 + $0x114] ss:$8 sps:$4 sm:$0xff]   ;;  %v1189_v50 = vld [vmem:[#allocation5 + $0x124] ss:$8 sps:$4 sm:$0xff]  }
  0x6c   :  { %v1187_v51 = vld [vmem:[#allocation5 + $0x120] ss:$8 sps:$4 sm:$0xff]   ;;  %v1192_v52 = vld [vmem:[#allocation5 + $0x134] ss:$8 sps:$4 sm:$0xff]   ;;  %v1190_v53 = vld [vmem:[#allocation5 + $0x130] ss:$8 sps:$4 sm:$0xff]  }
  0x6d   :  { %431 = vmatpush1.bf16.msra.mxu0 %v1144_v9  ;;  %1032 = vmatpush3.bf16.msra.mxu1 %v1211_v30  ;;  %v1195_v54 = vld [vmem:[#allocation5 + $0x144] ss:$8 sps:$4 sm:$0xff]   ;;  %v1193_v55 = vld [vmem:[#allocation5 + $0x140] ss:$8 sps:$4 sm:$0xff]   ;;  %v1198_v56 = vld [vmem:[#allocation5 + $0x154] ss:$8 sps:$4 sm:$0xff]  }
  0x6e   :  { %432 = vmatprep.subr.bf16.mxu0 %v1145_v10  ;;  %1033 = vmatprep.subr.bf16.mxu1 %v1212_v31  ;;  %v1196_v57 = vld [vmem:[#allocation5 + $0x150] ss:$8 sps:$4 sm:$0xff]   ;;  %v1201_v58 = vld [vmem:[#allocation5 + $0x164] ss:$8 sps:$4 sm:$0xff]   ;;  %v1199_v59 = vld [vmem:[#allocation5 + $0x160] ss:$8 sps:$4 sm:$0xff]  }
  0x6f   :  { %v1204_v60 = vld [vmem:[#allocation5 + $0x174] ss:$8 sps:$4 sm:$0xff]   ;;  %v1202_v61 = vld [vmem:[#allocation5 + $0x170] ss:$8 sps:$4 sm:$0xff]   ;;  %v1217_v63 = vld [vmem:[#allocation7 + $0x28] sm:$0xff]   ;;  %v158_v7 = vsub.s32 0, %v157_v6 }
  0x70   :  { %v1205_v62 = vld [vmem:[#allocation2 + $0x8] ss:$12 sps:$4 sm:$0xff]   ;;  %v154_v8 = vld [vmem:[%s1564_s2] sm:$0x3]  ;;  %v162_v9 = vsub.s32 1, %v157_v6  ;;  %v1222_v26 = vld [vmem:[#allocation8] sm:$0xff]  }
  0x71   :  { %433 = vmatpush1.bf16.msra.mxu0 %v1147_v11  ;;  %1034 = vmatpush3.bf16.msra.mxu1 %v1213_v34  ;;  %v1218_v0 = vld [vmem:[#allocation7 + $0x70] sm:$0xff]   ;;  %v1220_v2 = vld [vmem:[#allocation7 + $0x78] sm:$0xff]   ;;  %v159_v10 = vrot.slane %v154_v8, %v158_v7  ;;  %v1223_v27 = vld [vmem:[#allocation8 + $0x8] sm:$0xff]  }
  0x72   :  { %434 = vmatprep.subr.bf16.mxu0 %v1148_v12  ;;  %1035 = vmatprep.subr.bf16.mxu1 %v1214_v35  ;;  %v1219_v1 = vld [vmem:[#allocation7 + $0x30] sm:$0xff]   ;;  %v1221_v3 = vld [vmem:[#allocation7 + $0x38] sm:$0xff]   ;;  %v163_v11 = vrot.slane %v154_v8, %v162_v9  ;;  %v1226_v30 = vld [vmem:[#allocation8 + $0x20] sm:$0xff]  }
  0x73   :  { %v1227_v31 = vld [vmem:[#allocation8 + $0x28] sm:$0xff]  }
  0x74   :  { %v992_v35 = vld [vmem:[%s1566_s4] ss:$0 sm:$0xff] }
  0x75   :  { %435 = vmatpush1.bf16.msra.mxu0 %v1150_v14  ;;  %1036 = vmatpush3.bf16.msra.mxu1 %v1215_v37 }
  0x76   :  { %436 = vmatprep.subr.bf16.mxu0 %v1151_v15  ;;  %1037 = vmatprep.subr.bf16.mxu1 %v1216_v39 }
  0x79   :  { %437 = vmatpush1.bf16.msra.mxu0 %v1153_v16  ;;  %1038 = vmatpush3.bf16.msra.mxu1 %v1217_v63 }
  0x7a   :  { %438 = vmatprep.subr.bf16.mxu0 %v1154_v17  ;;  %1039 = vmatprep.subr.bf16.mxu1 %v1218_v0  ;;  %v1018_v0 = vld [vmem:[%s1570_s8] ss:$0 sm:$0xff] }
  0x7d   :  { %439 = vmatpush1.bf16.msra.mxu0 %v1156_v18  ;;  %1040 = vmatpush3.bf16.msra.mxu1 %v1219_v1 }
  0x7e   :  { %440 = vmatprep.subr.bf16.mxu0 %v1157_v19  ;;  %1041 = vmatprep.subr.bf16.mxu1 %v1220_v2 }
  0x81   :  { %441 = vmatpush1.bf16.msra.mxu0 %v1159_v20  ;;  %1042 = vmatpush3.bf16.msra.mxu1 %v1221_v3 }
  0x82   :  { %442 = vmatprep.subr.bf16.mxu0 %v1160_v21  ;;  %1067 = vmatprep.subr.bf16.mxu1 %v1390_v4 }
  0x85   :  { %443 = vmatpush1.bf16.msra.mxu0 %v1162_v24 }
  0x86   :  { %444 = vmatprep.subr.bf16.mxu0 %v1163_v28  ;;  %v1224_v28 = vld [vmem:[#allocation8 + $0x10] sm:$0xff]  }
  0x89   :  { %445 = vmatpush1.bf16.msra.mxu0 %v1165_v29  ;;  %v1225_v29 = vld [vmem:[#allocation8 + $0x18] sm:$0xff]  }
  0x8a   :  { %446 = vmatprep.subr.bf16.mxu0 %v1166_v32  ;;  %v1228_v32 = vld [vmem:[#allocation8 + $0x30] sm:$0xff]  }
  0x8d   :  { %447 = vmatpush1.bf16.msra.mxu0 %v1168_v33  ;;  %v1229_v33 = vld [vmem:[#allocation8 + $0x38] sm:$0xff]  }
  0x8e   :  { %448 = vmatprep.subr.bf16.mxu0 %v1169_v36 }
  0x91   :  { %449 = vmatpush1.bf16.msra.mxu0 %v1171_v38 }
  0x92   :  { %450 = vmatprep.subr.bf16.mxu0 %v1172_v40 }
  0x95   :  { %451 = vmatpush1.bf16.msra.mxu0 %v1174_v41 }
  0x96   :  { %452 = vmatprep.subr.bf16.mxu0 %v1175_v42 }
  0x99   :  { %453 = vmatpush1.bf16.msra.mxu0 %v1177_v43 }
  0x9a   :  { %465 = vmatprep.subr.bf16.mxu0 %v1183_v44 }
  0x9c   :  { %455 = vmatmul.mubr.bf16.vlgmr.msra.gmra.mrb[0].mxu0 %v1178_v45  ;;  %v1230_v45 = vld [vmem:[#allocation10] sm:$0xff]  }
  0x9d   :  { %466 = vmatpush1.bf16.msra.mxu0 %v1181_v46  ;;  %497 = vmatprep.mubr.bf16.mxu0 %v1389_v49  ;;  %v1233_v49 = vld [vmem:[#allocation10 + $0x18] sm:$0xff]  }
  0x9e   :  { %467 = vmatprep.subr.bf16.mxu0 %v1186_v47  ;;  %v1231_v47 = vld [vmem:[#allocation10 + $0x8] sm:$0xff]  }
  0xa1   :  { %468 = vmatpush1.bf16.msra.mxu0 %v1184_v48  ;;  %v1232_v48 = vld [vmem:[#allocation10 + $0x10] sm:$0xff]  }
  0xa2   :  { %469 = vmatprep.subr.bf16.mxu0 %v1189_v50  ;;  %v1234_v50 = vld [vmem:[#allocation10 + $0x20] sm:$0xff]  }
  0xa5   :  { %470 = vmatpush1.bf16.msra.mxu0 %v1187_v51  ;;  %v1235_v51 = vld [vmem:[#allocation10 + $0x28] sm:$0xff]  }
  0xa6   :  { %471 = vmatprep.subr.bf16.mxu0 %v1192_v52  ;;  %v1236_v52 = vld [vmem:[#allocation10 + $0x30] sm:$0xff]  }
  0xa9   :  { %472 = vmatpush1.bf16.msra.mxu0 %v1190_v53  ;;  %v1237_v53 = vld [vmem:[#allocation10 + $0x38] sm:$0xff]  }
  0xaa   :  { %473 = vmatprep.subr.bf16.mxu0 %v1195_v54  ;;  %v1009_v54 = vld [vmem:[%s1568_s6] ss:$0 sm:$0xff]  ;;  %s1348_s6 = scalar_lea.vmem %s928_s18, 256 }
  0xab   :  { %p1349_p12 = scmp.ne.s32.totalorder %s928_s18, %s1348_s6  ;;  %p1354_p0 = scmp.lt.s32.totalorder %s1348_s6, %s1348_s6 }
  0xad   :  { %474 = vmatpush1.bf16.msra.mxu0 %v1193_v55  ;;  %p1355_p1 = por %p1354_p0, %p1353_p13 }
  0xae   :  { %475 = vmatprep.subr.bf16.mxu0 %v1198_v56 }
  0xaf   :  { %p1356_p2 = pnand %p1355_p1, %p1349_p12 }
  0xb1   :  { %476 = vmatpush1.bf16.msra.mxu0 %v1196_v57 }
  0xb2   :  { %477 = vmatprep.subr.bf16.mxu0 %v1201_v58 }
  0xb5   :  { %478 = vmatpush1.bf16.msra.mxu0 %v1199_v59 }
  0xb6   :  { %479 = vmatprep.subr.bf16.mxu0 %v1204_v60 }
  0xb9   :  { %480 = vmatpush1.bf16.msra.mxu0 %v1202_v61 }
  0xbc   :  { %498 = vmatmul.mubr.bf16.vlgmr.msra.gmra.mrb[0].mxu0 %v1205_v62 }
 0x18f   :  { %v499_v12 = vpop.f32.mrb[0].mxu0 }
 0x190   :  { %v1107_v13 = vadd.f32 %v499_v12, %v159_v10  ;;  %v501_v14 = vpop.f32.mrb[1].mxu0 }
 0x191   :  { %v1108_v15 = vadd.f32 %v501_v14, %v163_v11  ;;  %v503_v16 = vpop.f32.mrb[2].mxu0 }
 0x192   :  { %v1109_v17 = vadd.f32 %v503_v16, %v159_v10  ;;  %v505_v18 = vpop.f32.mrb[3].mxu0  ;;  %v508_v20 = vmax.f32 %v1107_v13, 0.0 }
 0x193   :  { %v1110_v19 = vadd.f32 %v505_v18, %v163_v11  ;;  %v509_v22 = vmax.f32 %v1108_v15, 0.0 }
 0x194   :  { %v510_v21 = vmax.f32 %v1109_v17, 0.0 }
 0x195   :  { %v511_v23 = vmax.f32 %v1110_v19, 0.0 }
 0x196   :  { %v512_v24 = vpack.c.bf16 %v510_v21, %v508_v20 }
 0x197   :  { %v513_v25 = vpack.c.bf16 %v511_v23, %v509_v22 }
 0x199   :  { %681 = vmatprep.mubr.bf16.mxu1 %v513_v25 }
 0x19a   :  { %682 = vmatmul.mubr.bf16.vlgmr.msra.gmra.mrb[0].mxu1 %v512_v24 }
 0x19b   :  { %1068 = vmatpush3.bf16.msra.mxu1 %v1222_v26  ;;  %1083 = vmatprep.mubr.msk.bf16.mxu1 %vm1391_vm0, %v1390_v4 }
 0x19c   :  { %1069 = vmatprep.subr.bf16.mxu1 %v1390_v4 }
 0x19f   :  { %1070 = vmatpush3.bf16.msra.mxu1 %v1223_v27 }
 0x1a0   :  { %1071 = vmatprep.subr.bf16.mxu1 %v1390_v4 }
 0x1a3   :  { %1072 = vmatpush3.bf16.msra.mxu1 %v1224_v28 }
 0x1a4   :  { %1073 = vmatprep.subr.bf16.mxu1 %v1390_v4 }
 0x1a7   :  { %1074 = vmatpush3.bf16.msra.mxu1 %v1225_v29 }
 0x1a8   :  { %1075 = vmatprep.subr.bf16.mxu1 %v1390_v4 }
 0x1ab   :  { %1076 = vmatpush3.bf16.msra.mxu1 %v1226_v30 }
 0x1ac   :  { %1077 = vmatprep.subr.bf16.mxu1 %v1390_v4 }
 0x1af   :  { %1078 = vmatpush3.bf16.msra.mxu1 %v1227_v31 }
 0x1b0   :  { %1079 = vmatprep.subr.bf16.mxu1 %v1390_v4 }
 0x1b3   :  { %1080 = vmatpush3.bf16.msra.mxu1 %v1228_v32 }
 0x1b4   :  { %1081 = vmatprep.subr.bf16.mxu1 %v1390_v4 }
 0x1b7   :  { %1082 = vmatpush3.bf16.msra.mxu1 %v1229_v33 }
 0x1b8   :  { %1087 = vmatprep.subr.bf16.mxu1 %v1390_v4 }
 0x26d   :  { %v1043_v34 = vpop.f32.mrb[0].mxu1 }
 0x26e   :  { %v1044_v36 = vpop.f32.mrb[1].mxu1 }
 0x26f   :  { %v1045_v37 = vadd.f32 %v1044_v36, %v1043_v34  ;;  %v1046_v38 = vpop.f32.mrb[2].mxu1 }
 0x270   :  { %v1047_v39 = vpop.f32.mrb[3].mxu1 }
 0x271   :  { %v684_v40 = vadd.f32 %v1045_v37, %v992_v35  ;;  %v1048_v41 = vadd.f32 %v1047_v39, %v1046_v38 }
 0x273   :  { %v687_v42 = vadd.f32 %v1048_v41, %v992_v35  ;;  %v690_v43 = vmax.f32 %v684_v40, 0.0 }
 0x275   :  { %v691_v44 = vmax.f32 %v687_v42, 0.0 }
 0x277   :  { %v692_v46 = vpack.c.bf16 %v691_v44, %v690_v43 }
 0x279   :  { %1084 = vmatmul.mubr.bf16.vlgmr.msra.gmra.mrb[4].mxu1 %v692_v46 }
 0x27a   :  { %1088 = vmatpush3.bf16.msra.mxu1 %v1230_v45  ;;  %1103 = vmatprep.mubr.msk.bf16.mxu1 %vm1391_vm0, %v1390_v4 }
 0x27b   :  { %1089 = vmatprep.subr.bf16.mxu1 %v1390_v4 }
 0x27e   :  { %1090 = vmatpush3.bf16.msra.mxu1 %v1231_v47 }
 0x27f   :  { %1091 = vmatprep.subr.bf16.mxu1 %v1390_v4 }
 0x282   :  { %1092 = vmatpush3.bf16.msra.mxu1 %v1232_v48 }
 0x283   :  { %1093 = vmatprep.subr.bf16.mxu1 %v1390_v4 }
 0x286   :  { %1094 = vmatpush3.bf16.msra.mxu1 %v1233_v49 }
 0x287   :  { %1095 = vmatprep.subr.bf16.mxu1 %v1390_v4 }
 0x28a   :  { %1096 = vmatpush3.bf16.msra.mxu1 %v1234_v50 }
 0x28b   :  { %1097 = vmatprep.subr.bf16.mxu1 %v1390_v4 }
 0x28e   :  { %1098 = vmatpush3.bf16.msra.mxu1 %v1235_v51 }
 0x28f   :  { %1099 = vmatprep.subr.bf16.mxu1 %v1390_v4 }
 0x292   :  { %1100 = vmatpush3.bf16.msra.mxu1 %v1236_v52 }
 0x293   :  { %1101 = vmatprep.subr.bf16.mxu1 %v1390_v4 }
 0x296   :  { %1102 = vmatpush3.bf16.msra.mxu1 %v1237_v53 }
 0x34c   :  { %v798_v55 = vpop.f32.mrb[4].mxu1 }
 0x34d   :  { %v799_v56 = vadd.f32 %v1009_v54, %v798_v55  ;;  %v1085_v57 = vpop.f32.mrb[5].mxu1 }
 0x34e   :  { %v801_v58 = vpop.f32.mrb[6].mxu1 }
 0x34f   :  { %v802_v59 = vadd.f32 %v1009_v54, %v801_v58  ;;  %v1086_v60 = vpop.f32.mrb[7].mxu1  ;;  %v805_v61 = vmax.f32 %v799_v56, 0.0 }
 0x351   :  { %v806_v62 = vmax.f32 %v802_v59, 0.0 }
 0x353   :  { %v807_v63 = vpack.c.bf16 %v806_v62, %v805_v61 }
 0x355   :  { %1104 = vmatmul.mubr.bf16.vlgmr.msra.gmra.mrb[8].mxu1 %v807_v63 }
 0x428   :  { %v913_v1 = vpop.f32.mrb[8].mxu1 }
 0x429   :  { %v914_v2 = vadd.f32 %v1018_v0, %v913_v1  ;;  %v1105_v3 = vpop.f32.mrb[9].mxu1 }
 0x42a   :  { %v916_v4 = vpop.f32.mrb[10].mxu1 }
 0x42b   :  { %920 = vst [vmem:[#allocation11] sm:$0xff] %v914_v2  ;;  %v917_v5 = vadd.f32 %v1018_v0, %v916_v4  ;;  %v1106_v6 = vpop.f32.mrb[11].mxu1 }
 0x42d   :  { %921 = vst [vmem:[#allocation11 + $0x8] sm:$0xff] %v917_v5 }
 0x42e   :  { %1359 = shalt.err (!%p1356_p2)
}
 0x42f   :  { %s1360_s22 = scalar_lea.hbm %s1571_s9, 256 }
 0x430   :  { %p1361_p3 = scmp.ne.s32.totalorder %s1571_s9, %s1360_s22  ;;  %p1364_p4 = scmp.lt.u32.totalorder %s1360_s22, %s1571_s9 }
 0x432   :  { %p1366_p5 = pnand %p1364_p4, %p1361_p3 }
 0x434   :  { %1369 = shalt.err (!%p1366_p5)
}
 0x435   :  { %933 = dma.vmem_to_hbm [thread:$0]  %s928_s18, 256, %s1571_s9, [#allocation4], %s1379_s19, %s1379_s19, %s1380_s20  }
 0x436   :  { %1376 = dma.done.wait [#allocation4], 256  }
 0x437   :  { %1377 = vsyncadd [#allocation4], 4294967040 }
 0x438   :  { %937 = vsyncpa [#allocation3], 1 }
 0x439   :  { %938 = vsyncpa [#allocation6], 1 }
 0x43a   :  { %939 = vsyncpa [#allocation9], 1 }
 0x43b   :  { %940 = vsyncpa [#allocation4], 1 }

</bundles_post_ra>
